<compile_context>
chip_gen: v7x
topology: tpu7x:2x2x1
jax: 0.10.0
libtpu: 0.0.40
codegen_flags: <defaults>
</compile_context>

<pallas_src>
import jax
import jax.numpy as jnp
from jax.experimental import pallas as pl
from jax.experimental.pallas import tpu as pltpu


# ---------------------------------------------------------------------------
# Small integer helpers
# ---------------------------------------------------------------------------
def _cdiv(a, b):
    return -(-a // b)


def _round_down(v, m):
    return (v // m) * m


def _round_up(v, m):
    return _cdiv(v, m) * m


# ---------------------------------------------------------------------------
# Fused operator construction (parameter-sized, plain JAX — runs once)
# ---------------------------------------------------------------------------
def _build_fused_operator(supports, nodevec1, nodevec2, w, b, *, C, K, order,
                          include_self, is_adp):
    adj = [a.astype(jnp.float32) for a in supports]
    if is_adp:
        logits = jnp.maximum(
            nodevec1.astype(jnp.float32) @ nodevec2.astype(jnp.float32), 0.0)
        adj = adj + [jax.nn.softmax(logits, axis=1)]   # softmax over dim=1

    hops = []                                          # order matches torch.cat
    if include_self:
        hops.append(jnp.eye(K, dtype=jnp.float32))
    for a in adj:
        p = a
        hops.append(p)
        for _ in range(2, order + 1):
            p = a @ p
            hops.append(p)
    P = jnp.stack(hops, axis=0)                        # (J, K, K); P[j, w, v]
    J = P.shape[0]

    Wr = w.astype(jnp.float32).reshape(C, J, C)        # W[co, j, ci]
    # M[co, w, ci, v] = sum_j W[co, j, ci] * P[j, w, v]
    M = jnp.einsum('xjc,jwv->xwcv', Wr, P)
    M2 = M.reshape(C * K, C * K)                       # rows co*K+w, cols ci*K+v
    bvec = jnp.repeat(b.astype(jnp.float32), K).reshape(C * K, 1)
    return M2, bvec


# ---------------------------------------------------------------------------
# Pallas kernel: out_block = M @ x_block + bias   (lane dim = L tile)
# ---------------------------------------------------------------------------
def _fused_gcn_kernel(x_ref, m_ref, b_ref, o_ref):
    # x_ref: (1, CK, TL)   m_ref: (CK, CK) f32   b_ref: (CK, 1) f32
    # o_ref: (1, CK, TL).  MXU accumulate stays in f32 regardless of x dtype.
    y = jnp.dot(m_ref[...], x_ref[0], preferred_element_type=jnp.float32)
    o_ref[0] = (y + b_ref[...]).astype(o_ref.dtype)


# ---------------------------------------------------------------------------
# Generation-aware VMEM budget & lane-tile selection
# ---------------------------------------------------------------------------
def _vmem_capacity_bytes():
    """Per-core VMEM capacity; conservative 64 MiB (v7x) if the query fails."""
    try:
        info = pltpu.get_tpu_info()
        cap = int(getattr(info, "vmem_capacity_bytes", 0) or 0)
        if cap > 0:
            return cap
    except Exception:
        pass
    return 64 * 1024 * 1024


def _pick_l_tile(L, ck, *, x_itemsize, out_itemsize, m_itemsize,
                 budget_bytes, B):
    """Largest lane tile (multiple of 128, never wider than L) that fits the
    VMEM budget.  Resident per step ≈ double-buffered x/out blocks + the f32
    matmul result + the (single-buffered) constant operator + bias."""
    if L <= 128:
        return L                                       # full-dim block always legal
    per_col = ck * (2 * x_itemsize + 2 * out_itemsize + 4)   # +4: f32 dot result
    fixed = ck * ck * m_itemsize + ck * 4
    max_tl = max(128, (budget_bytes - fixed) // max(per_col, 1))
    tl = max(128, _round_down(max_tl, 128))
    tl = min(tl, _round_down(L, 128))                  # ragged tail handled by cdiv grid
    # v7x megacore: make sure there are >= 2 grid points to shard across cores.
    if B * _cdiv(L, tl) < 2 and L >= 256:
        tl = max(128, _round_up(_cdiv(L, 2), 128))
    return tl


# ---------------------------------------------------------------------------
# Wrapper
# ---------------------------------------------------------------------------
def adaptive_gcn_pallas(x, base_shape, supports, nodevec1, nodevec2, w, b, *,
                        order=2, include_self=True, is_adp=True,
                        l_tile=None, compute_dtype=None, out_dtype=None):
    """AdaptiveGCN forward.

    compute_dtype: dtype x is fed to the kernel in (None -> x.dtype).  The
        fused operator stays float32 and the MXU accumulates in float32, so
        bfloat16 only shrinks the x bytes (the kernel is HBM-bound, so this is
        ~a 2x cut of the dominant cost) at a small numerical cost.
    """
    B, C, K, L = base_shape
    if K == 1:
        return x
    CK = C * K
    S = len(supports) + (1 if is_adp else 0)
    J = order * S + (1 if include_self else 0)
    assert w.shape == (C, J * C) and b.shape == (C,)

    M2, bvec = _build_fused_operator(
        supports, nodevec1, nodevec2, w, b,
        C=C, K=K, order=order, include_self=include_self, is_adp=is_adp)

    cdt = jnp.dtype(compute_dtype) if compute_dtype is not None else jnp.dtype(x.dtype)
    odt = jnp.dtype(out_dtype) if out_dtype is not None else jnp.dtype(x.dtype)
    # (B, C, K*L) and (B, C*K, L) are the same row-major buffer: free reshape.
    x_in = x.reshape(B, CK, L).astype(cdt)
    m_in = M2                                          # keep the operator in f32

    vmem_cap = _vmem_capacity_bytes()
    budget = min(vmem_cap // 2, 64 * 1024 * 1024)      # ~64 MiB v5e/v6e, ~32 MiB v7x
    vmem_limit = min((vmem_cap * 3) // 4, 96 * 1024 * 1024)

    if l_tile is not None:
        tl = l_tile
        assert tl == L or tl % 128 == 0, "l_tile must be L or a multiple of 128"
    else:
        tl = _pick_l_tile(L, CK,
                          x_itemsize=cdt.itemsize, out_itemsize=odt.itemsize,
                          m_itemsize=m_in.dtype.itemsize,
                          budget_bytes=budget, B=B)
    grid = (B, _cdiv(L, tl))                           # ragged last L tile is fine

    cost = pl.CostEstimate(
        flops=2 * B * CK * CK * L,
        bytes_accessed=B * CK * L * (cdt.itemsize + odt.itemsize)
                       + CK * CK * m_in.dtype.itemsize + CK * 4,
        transcendentals=0)

    def _call(single_buffer_const):
        x_spec = pl.BlockSpec((1, CK, tl), lambda bi, li: (bi, 0, li))
        if single_buffer_const:
            # M / bias never change block index -> a second pipeline buffer is
            # pure VMEM waste (matters on v7x's 64 MiB for large CK).
            m_spec = pl.BlockSpec((CK, CK), lambda bi, li: (0, 0),
                                  pipeline_mode=pl.Buffered(1))
            b_spec = pl.BlockSpec((CK, 1), lambda bi, li: (0, 0),
                                  pipeline_mode=pl.Buffered(1))
        else:
            m_spec = pl.BlockSpec((CK, CK), lambda bi, li: (0, 0))
            b_spec = pl.BlockSpec((CK, 1), lambda bi, li: (0, 0))
        return pl.pallas_call(
            _fused_gcn_kernel,
            out_shape=jax.ShapeDtypeStruct((B, CK, L), odt),
            grid=grid,
            in_specs=[x_spec, m_spec, b_spec],
            out_specs=pl.BlockSpec((1, CK, tl), lambda bi, li: (bi, 0, li)),
            compiler_params=pltpu.CompilerParams(
                dimension_semantics=("parallel", "parallel"),
                vmem_limit_bytes=vmem_limit),
            cost_estimate=cost,
        )(x_in, m_in, bvec)

    try:
        out = _call(single_buffer_const=True)
    except Exception:
        # TODO(synk): pipeline_mode=pl.Buffered(1) unsupported on this Pallas
        # version; fall back to default double-buffered constant operands.
        out = _call(single_buffer_const=False)

    # (B, C*K, L) -> (B, C, K*L): free reshape of the same row-major buffer.
    return out.reshape(B, C, K * L)


# ---------------------------------------------------------------------------
# Pure-JAX reference (mirrors the PyTorch forward hop-by-hop)
# ---------------------------------------------------------------------------
def adaptive_gcn_ref(x, base_shape, supports, nodevec1, nodevec2, w, b, *,
                     order=2, include_self=True, is_adp=True):
    B, C, K, L = base_shape
    if K == 1:
        return x
    xr = x.reshape(B, C, K, L).transpose(0, 3, 1, 2).reshape(B * L, C, K)
    out = [xr] if include_self else []
    adj = list(supports)
    if is_adp:
        adp = jax.nn.softmax(jnp.maximum(nodevec1 @ nodevec2, 0.0), axis=1)
        adj = adj + [adp]
    for a in adj:
        x1 = jnp.einsum('ncv,wv->ncw', xr, a)
        out.append(x1)
        for _ in range(2, order + 1):
            x1 = jnp.einsum('ncv,wv->ncw', x1, a)
            out.append(x1)
    cat = jnp.concatenate(out, axis=1)                 # (N, J*C, K)
    o = jnp.einsum('oi,nik->nok', w, cat) + b[None, :, None]
    o = o.reshape(B, L, C, K).transpose(0, 2, 3, 1).reshape(B, C, K * L)
    return o


if __name__ == "__main__":
    B, C, K, L = 2, 4, 16, 128
    E = 10
    order, include_self, is_adp = 2, True, True
    support_len = 2 + (1 if is_adp else 0)
    c_in_mlp = (order * support_len + (1 if include_self else 0)) * C

    key = jax.random.PRNGKey(0)
    k_x, k_a0, k_a1, k_n1, k_n2, k_w, k_b, k_x2 = jax.random.split(key, 8)

    x = jax.random.normal(k_x, (B, C, K * L), dtype=jnp.float32)
    support0 = jax.nn.softmax(jax.random.normal(k_a0, (K, K)), axis=1)
    support1 = jax.nn.softmax(jax.random.normal(k_a1, (K, K)), axis=1)
    nodevec1 = jax.random.normal(k_n1, (K, E), dtype=jnp.float32)
    nodevec2 = jax.random.normal(k_n2, (E, K), dtype=jnp.float32)
    # Conv2d(c_in_mlp, C, kernel_size=1) parameters (synthetic init)
    w_mlp = (jax.random.normal(k_w, (C, c_in_mlp), dtype=jnp.float32)
             / jnp.sqrt(c_in_mlp))
    b_mlp = jax.random.normal(k_b, (C,), dtype=jnp.float32) * 0.1

    # --- Test 1: default f32 path, tight tolerance ---------------------------
    out = adaptive_gcn_pallas(
        x, (B, C, K, L), [support0, support1], nodevec1, nodevec2,
        w_mlp, b_mlp, order=order, include_self=include_self, is_adp=is_adp)
    out = jax.block_until_ready(out)
    ref = adaptive_gcn_ref(
        x, (B, C, K, L), [support0, support1], nodevec1, nodevec2,
        w_mlp, b_mlp, order=order, include_self=include_self, is_adp=is_adp)
    assert out.shape == (B, C, K * L), out.shape
    err = float(jnp.max(jnp.abs(out - ref)))
    assert jnp.allclose(out, ref, atol=1e-4, rtol=1e-4), err

    # --- Test 2: bf16 x, B=1, ragged L (exercises cdiv grid + core split) ----
    B2, L2 = 1, 192
    x2 = jax.random.normal(k_x2, (B2, C, K * L2), dtype=jnp.float32)
    out2 = adaptive_gcn_pallas(
        x2, (B2, C, K, L2), [support0, support1], nodevec1, nodevec2,
        w_mlp, b_mlp, order=order, include_self=include_self, is_adp=is_adp,
        compute_dtype=jnp.bfloat16)
    out2 = jax.block_until_ready(out2)
    ref2 = adaptive_gcn_ref(
        x2, (B2, C, K, L2), [support0, support1], nodevec1, nodevec2,
        w_mlp, b_mlp, order=order, include_self=include_self, is_adp=is_adp)
    assert out2.shape == (B2, C, K * L2), out2.shape
    err2 = float(jnp.max(jnp.abs(out2 - ref2)))
    assert jnp.allclose(out2, ref2, atol=5e-2, rtol=5e-2), err2

    print("KERNEL_OK")
</pallas_src>

<mosaic_0001>
module attributes {stable_mosaic.version = 11 : i64} {
  func.func @_fused_gcn_kernel(%arg0: i32, %arg1: i32, %arg2: memref<1x64x128xf32, #tpu.memory_space<vmem>>, %arg3: memref<64x64xf32, #tpu.memory_space<vmem>>, %arg4: memref<64x1xf32, #tpu.memory_space<vmem>>, %arg5: memref<1x64x128xf32, #tpu.memory_space<vmem>>) attributes {dimension_semantics = [#tpu.dimension_semantics<parallel>, #tpu.dimension_semantics<parallel>], iteration_bounds = array<i64: 2, 1>, scalar_prefetch = 0 : i64, scratch_operands = 0 : i64, tpu.core_type = #tpu.core_type<tc>, window_params = [{transform_indices = @transform_0, window_bounds = array<i64: 1, 64, 128>}, {pipeline_mode = #tpu.pipeline_mode<synchronous>, transform_indices = @transform_1, window_bounds = array<i64: 64, 64>}, {pipeline_mode = #tpu.pipeline_mode<synchronous>, transform_indices = @transform_2, window_bounds = array<i64: 64, 1>}, {transform_indices = @transform_3, window_bounds = array<i64: 1, 64, 128>}]} {
    %c0 = arith.constant 0 : index
    %c0_0 = arith.constant 0 : index
    %0 = vector.load %arg3[%c0, %c0_0] : memref<64x64xf32, #tpu.memory_space<vmem>>, vector<64x64xf32>
    %c0_1 = arith.constant 0 : index
    %c0_2 = arith.constant 0 : index
    %c0_3 = arith.constant 0 : index
    %1 = vector.load %arg2[%c0_1, %c0_2, %c0_3] : memref<1x64x128xf32, #tpu.memory_space<vmem>>, vector<1x64x128xf32>
    %2 = vector.shape_cast %1 : vector<1x64x128xf32> to vector<64x128xf32>
    %cst = arith.constant dense<0.000000e+00> : vector<64x128xf32>
    %3 = tpu.matmul %0, %2, %cst {dimension_numbers = #tpu.dot_dimension_numbers<[1], [0], [0], [1], [0, 0, 1, 1], [], []>} : vector<64x64xf32>, vector<64x128xf32>, vector<64x128xf32> -> vector<64x128xf32>
    %c0_4 = arith.constant 0 : index
    %c0_5 = arith.constant 0 : index
    %4 = vector.load %arg4[%c0_4, %c0_5] : memref<64x1xf32, #tpu.memory_space<vmem>>, vector<64x1xf32>
    %5 = vector.broadcast %4 : vector<64x1xf32> to vector<64x128xf32>
    %6 = arith.addf %3, %5 : vector<64x128xf32>
    %c0_6 = arith.constant 0 : index
    %c0_7 = arith.constant 0 : index
    %c0_8 = arith.constant 0 : index
    %7 = vector.load %arg5[%c0_6, %c0_7, %c0_8] : memref<1x64x128xf32, #tpu.memory_space<vmem>>, vector<1x64x128xf32>
    %8 = vector.shape_cast %7 : vector<1x64x128xf32> to vector<64x128xf32>
    %9 = vector.shape_cast %6 : vector<64x128xf32> to vector<1x64x128xf32>
    tpu.vector_store %arg5[%c0_6, %c0_7, %c0_8], %9 {strides = array<i32>} : memref<1x64x128xf32, #tpu.memory_space<vmem>>, vector<1x64x128xf32>,
    return
  }
  func.func @transform_0(%arg0: i32, %arg1: i32) -> (i32, i32, i32) {
    %c0_i32 = arith.constant 0 : i32
    %c0_i32_0 = arith.constant 0 : i32
    return %arg0, %c0_i32, %arg1 : i32, i32, i32
  }
  func.func @transform_1(%arg0: i32, %arg1: i32) -> (i32, i32) {
    %c0_i32 = arith.constant 0 : i32
    %c0_i32_0 = arith.constant 0 : i32
    %c0_i32_1 = arith.constant 0 : i32
    return %c0_i32, %c0_i32_0 : i32, i32
  }
  func.func @transform_2(%arg0: i32, %arg1: i32) -> (i32, i32) {
    %c0_i32 = arith.constant 0 : i32
    %c0_i32_0 = arith.constant 0 : i32
    %c0_i32_1 = arith.constant 0 : i32
    return %c0_i32, %c0_i32_0 : i32, i32
  }
  func.func @transform_3(%arg0: i32, %arg1: i32) -> (i32, i32, i32) {
    %c0_i32 = arith.constant 0 : i32
    %c0_i32_0 = arith.constant 0 : i32
    return %arg0, %c0_i32, %arg1 : i32, i32, i32
  }
}

module attributes {stable_mosaic.version = 11 : i64} {
  func.func @_fused_gcn_kernel(%arg0: i32, %arg1: i32, %arg2: memref<1x64x128xf32, #tpu.memory_space<vmem>>, %arg3: memref<64x64xf32, #tpu.memory_space<vmem>>, %arg4: memref<64x1xf32, #tpu.memory_space<vmem>>, %arg5: memref<1x64x128xf32, #tpu.memory_space<vmem>>) attributes {dimension_semantics = [#tpu.dimension_semantics<parallel>, #tpu.dimension_semantics<parallel>], iteration_bounds = array<i64: 2, 1>, scalar_prefetch = 0 : i64, scratch_operands = 0 : i64, tpu.core_type = #tpu.core_type<tc>, window_params = [{transform_indices = @transform_0, window_bounds = array<i64: 1, 64, 128>}, {pipeline_mode = #tpu.pipeline_mode<synchronous>, transform_indices = @transform_1, window_bounds = array<i64: 64, 64>}, {pipeline_mode = #tpu.pipeline_mode<synchronous>, transform_indices = @transform_2, window_bounds = array<i64: 64, 1>}, {transform_indices = @transform_3, window_bounds = array<i64: 1, 64, 128>}]} {
    %c0 = arith.constant 0 : index
    %c0_0 = arith.constant 0 : index
    %0 = vector.load %arg3[%c0, %c0_0] : memref<64x64xf32, #tpu.memory_space<vmem>>, vector<64x64xf32>
    %c0_1 = arith.constant 0 : index
    %c0_2 = arith.constant 0 : index
    %c0_3 = arith.constant 0 : index
    %1 = vector.load %arg2[%c0_1, %c0_2, %c0_3] : memref<1x64x128xf32, #tpu.memory_space<vmem>>, vector<1x64x128xf32>
    %2 = vector.shape_cast %1 : vector<1x64x128xf32> to vector<64x128xf32>
    %cst = arith.constant dense<0.000000e+00> : vector<64x128xf32>
    %3 = tpu.matmul %0, %2, %cst {dimension_numbers = #tpu.dot_dimension_numbers<[1], [0], [0], [1], [0, 0, 1, 1], [], []>} : vector<64x64xf32>, vector<64x128xf32>, vector<64x128xf32> -> vector<64x128xf32>
    %c0_4 = arith.constant 0 : index
    %c0_5 = arith.constant 0 : index
    %4 = vector.load %arg4[%c0_4, %c0_5] : memref<64x1xf32, #tpu.memory_space<vmem>>, vector<64x1xf32>
    %5 = vector.broadcast %4 : vector<64x1xf32> to vector<64x128xf32>
    %6 = arith.addf %3, %5 : vector<64x128xf32>
    %c0_6 = arith.constant 0 : index
    %c0_7 = arith.constant 0 : index
    %c0_8 = arith.constant 0 : index
    %7 = vector.load %arg5[%c0_6, %c0_7, %c0_8] : memref<1x64x128xf32, #tpu.memory_space<vmem>>, vector<1x64x128xf32>
    %8 = vector.shape_cast %7 : vector<1x64x128xf32> to vector<64x128xf32>
    %9 = vector.shape_cast %6 : vector<64x128xf32> to vector<1x64x128xf32>
    tpu.vector_store %arg5[%c0_6, %c0_7, %c0_8], %9 {strides = array<i32>} : memref<1x64x128xf32, #tpu.memory_space<vmem>>, vector<1x64x128xf32>,
    return
  }
  func.func @transform_0(%arg0: i32, %arg1: i32) -> (i32, i32, i32) {
    %c0_i32 = arith.constant 0 : i32
    %c0_i32_0 = arith.constant 0 : i32
    return %arg0, %c0_i32, %arg1 : i32, i32, i32
  }
  func.func @transform_1(%arg0: i32, %arg1: i32) -> (i32, i32) {
    %c0_i32 = arith.constant 0 : i32
    %c0_i32_0 = arith.constant 0 : i32
    %c0_i32_1 = arith.constant 0 : i32
    return %c0_i32, %c0_i32_0 : i32, i32
  }
  func.func @transform_2(%arg0: i32, %arg1: i32) -> (i32, i32) {
    %c0_i32 = arith.constant 0 : i32
    %c0_i32_0 = arith.constant 0 : i32
    %c0_i32_1 = arith.constant 0 : i32
    return %c0_i32, %c0_i32_0 : i32, i32
  }
  func.func @transform_3(%arg0: i32, %arg1: i32) -> (i32, i32, i32) {
    %c0_i32 = arith.constant 0 : i32
    %c0_i32_0 = arith.constant 0 : i32
    return %arg0, %c0_i32, %arg1 : i32, i32, i32
  }
}

</mosaic_0001>

<bundles_post_ra>
// kernel: tpu_custom_call.1
= control target key start
LH: loop header
LB: loop body
LE: loop exit
PB: predicated region body
PF: predicated region fallthrough
CT: control target
= control target key end

     0   :  { %8 = vsyncpa [#allocation3], 0  ;;  %s1046_s0 = inlined_call_operand.hbm [shape: f32[2,64,128], index: 0, kind: input, shape index: {}]   ;;  %s1047_s1 = inlined_call_operand.vmem [shape: f32[64,64], index: 1, kind: input, shape index: {}]   ;;  %s1048_s2 = inlined_call_operand.vmem [shape: f32[64,1], index: 2, kind: input, shape index: {}]   ;;  %s1049_s3 = inlined_call_operand.hbm [shape: f32[2,64,128], index: 3, kind: output, shape index: {}]  }
   0x1   :  { %10 = vsyncpa [#allocation3 + $0x1], 0 }
   0x2   :  { %11 = vsyncpa [#allocation4], 0 }
   0x3   :  { %13 = vsyncpa [#allocation4 + $0x1], 0  ;;  %s811_s12 = smov 0   ;;  %s813_s13 = smov 0  }
   0x4   :  { %s815_s14 = smov 0   ;;  %s817_s15 = smov 0  }
   0x5   :  { %s819_s16 = smov 0   ;;  %s821_s17 = smov 0  }
   0x6 LB: > { %s508_s18 = sadd.s32 4294967295, %s782_s17   ;;  %s509_s19 = sadd.s32 4294967294, %s782_s17   ;;  %s782_s17 = sphi %s821_s17, %s19_s17   ;;  %s778_s16 = sphi %s819_s16, %s1064_s16   ;;  %s774_s15 = sphi %s817_s15, %s1063_s15   ;;  %s770_s14 = sphi %s815_s14, %s1062_s14   ;;  %s766_s13 = sphi %s813_s13, %s1061_s13   ;;  %s762_s12 = sphi %s811_s12, %s1060_s12  }
   0x7   : > { %s31_s20 = sadd.s32 1, %s778_s16  ;;  %s40_s21 = sadd.s32 1, %s770_s14 }
   0x8   : > { %p33_p0 = scmp.ge.s32.totalorder %s31_s20, 2  ;;  %p47_p1 = scmp.ne.s32.totalorder %s770_s14, %s766_s13 }
   0x9   : > { %p48_p2 = scmp.eq.s32.totalorder %s782_s17, 0  ;;  %p53_p3 = scmp.ne.s32.totalorder %s766_s13, %s762_s12 }
   0xa   : > { %s1066_s20 = smov (%p33_p0, %s31_s20), 0  ;;  %p54_p5 = scmp.eq.s32.totalorder %s508_s18, 0 }
   0xb   : > { %p852_p4 = por %p48_p2, %p47_p1  ;;  %s35_s23 = ssub.s32 %s778_s16, %s1066_s20 }
   0xc   : > { %p121_p6 = scmp.eq.s32.totalorder %s508_s18, 1  ;;  %p38_p7 = scmp.eq.s32.totalorder %s35_s23, 0 }
   0xd   : > { %p858_p8 = por %p54_p5, %p53_p3  ;;  %p127_p10 = scmp.eq.s32.totalorder %s509_s19, 1 }
   0xe   : > { %p862_p9 = por %p121_p6, %p47_p1  ;;  %p613_p13 = scmp.lt.s32.totalorder %s782_s17, 2 }
   0xf   : > { %s867_s26 = scalar_select %p38_p7, %s770_s14, %s40_s21  }
  0x10   : > { %s1053_s25 = scalar_select %p862_p9, 1, 0 }
  0x11   : > { %p869_p11 = por %p127_p10, %p53_p3  ;;  %s153_s28 = sand.u32 1, %s770_s14  }
  0x12   : > { %s512_s29 = sshll.u32 %s153_s28, 6  ;;  %s531_s30 = sshll.u32 %s778_s16, 10 }
  0x13   : > { %s1054_s27 = scalar_select %p869_p11, 1, 0 }
  0x14   : > { %s880_s6 = scalar_lea.hbm %s1046_s0, %s531_s30  ;;  %s157_s7 = scalar_lea.vmem [#allocation2], %s512_s29 }
  0x15   : > { %s165_s8 = sshll.u32 %s157_s7, 4  ;;  %p886_p0 = pnand %p613_p13, %p852_p4  ;;  %s882_s8 = int_to_ptr.vmem [resolvable:$true] %s165_s8 }
  0x16   : > { %s891_s10 = scalar_lea.sflag [#allocation3], %s153_s28  ;;  %s670_s11 = scalar_lea.hbm %s880_s6, 1024 }
  0x17   : > { %p671_p2 = scmp.ne.s32.totalorder %s880_s6, %s670_s11  ;;  %p672_p3 = pneg %p886_p0 }
  0x18   : > { %s675_s21 = scalar_lea.hbm %s1046_s0, 2048  ;;  %p676_p4 = scmp.lt.u32.totalorder %s880_s6, %s1046_s0 }
  0x19   : > { %p673_p5 = pnand %p672_p3, %p671_p2  ;;  %p677_p7 = scmp.lt.u32.totalorder %s675_s21, %s670_s11 }
  0x1a   : > { %p679_p13 = scmp.lt.u32.totalorder %s670_s11, %s880_s6 }
  0x1b   : > { %p674_p6 = pneg %p673_p5  ;;  %p678_p10 = por %p677_p7, %p676_p4 }
  0x1d   : > { %p680_p12 = por %p679_p13, %p678_p10 }
  0x1f   : > { %p681_p1 = pnand %p680_p12, %p674_p6 }
  0x21   : > { %684 = shalt.err (!%p681_p1)
}
  0x22   : > { %s685_s28 = scalar_lea.vmem %s882_s8, 1024  ;;  %s784_s29 = smov [#allocation2]  }
  0x23   : > { %p686_p2 = scmp.ne.s32.totalorder %s882_s8, %s685_s28  ;;  %s690_s30 = sshll.u32 %s784_s29, 4  ;;  %s691_s30 = int_to_ptr.vmem [resolvable:$false] %s690_s30 }
  0x24   : > { %s692_s4 = scalar_lea.vmem %s691_s30, 2048  ;;  %p693_p9 = scmp.lt.s32.totalorder %s882_s8, %s691_s30 }
  0x25   : > { %p688_p5 = pnand %p686_p2, %p672_p3  ;;  %p694_p4 = scmp.lt.s32.totalorder %s692_s4, %s685_s28 }
  0x27   : > { %p689_p11 = pneg %p688_p5  ;;  %p695_p7 = por %p694_p4, %p693_p9 }
  0x29   : > { %p696_p10 = pnand %p695_p7, %p689_p11 }
  0x2b   : > { %699 = shalt.err (!%p696_p10)
}
  0x2c   : > { %s785_s5 = smov 128   ;;  %s786_s7 = smov 8  }
  0x2d   : > { %608 = dma.hbm_to_vmem [thread:$0]  (!%p886_p0), %s880_s6, 1024, %s882_s8, %s891_s10, %s785_s5, %s785_s5, %s786_s7  }
  0x2e   : > { %p173_p12 = scmp.lt.s32.totalorder %s782_s17, 3  ;;  %p1056_p1 = scmp.ge.s32.totalorder %s782_s17, 1 }
  0x30   : > { %p174_p3 = pnand %p1056_p1, %p173_p12 }
  0x31   : > { %s923_s11 = sand.u32 (!%p174_p3), 1, %s766_s13  }
  0x32   : > { %177 = sbr.rel (%p174_p3) target bundleno = 311 (0x137), region = 32  ;;  %s516_s18 = sshll.u32 (!%p174_p3), %s923_s11, 6 }
  0x33   : > { %s180_s19 = scalar_lea.sflag (!%p174_p3), [#allocation3], %s923_s11  ;;  %s183_s21 = scalar_lea.vmem (!%p174_p3), [#allocation2], %s516_s18 }
  0x39   : > { %753 = dma.done.wait (%p858_p8), %s180_s19, 1024  }
  0x3a   : > { %755 = vsyncadd (%p858_p8), %s180_s19, 4294966272  ;;  %v787_v0 = vmov 0   ;;  %v214_v1 = vld [vmem:[%s183_s21] sm:$0xff]  ;;  %v215_v2 = vld [vmem:[%s183_s21 + $0x8] sm:$0xff]  ;;  %vm270_vm0 = vcmask 523264   ;;  %s205_s24 = scalar_lea.vmem [#allocation5], %s516_s18 }
  0x3b   : > { %669 = vset.pattern.permute.xlu1 %v787_v0  ;;  %668 = vset.pattern.permute.xlu0 %v787_v0  ;;  %v216_v3 = vld [vmem:[%s183_s21 + $0x10] sm:$0xff]  ;;  %v577_v4 = vpack.c.bf16 %v215_v2, %v214_v1  ;;  %v217_v5 = vld [vmem:[%s183_s21 + $0x18] sm:$0xff]  ;;  %v218_v7 = vld [vmem:[%s183_s21 + $0x20] sm:$0xff]  ;;  %s423_s9 = sshll.u32 %s205_s24, 4  ;;  %s532_s10 = sshll.u32 %s774_s15, 10  ;;  %s992_s9 = int_to_ptr.vmem [resolvable:$true] %s423_s9 }
  0x3c   : > { %v581_v6 = vpack.c.bf16 %v217_v5, %v216_v3  ;;  %v219_v8 = vld [vmem:[%s183_s21 + $0x28] sm:$0xff]  ;;  %v206_v9 = vld [vmem:[%s1047_s1] sm:$0xff]  ;;  %v224_v12 = vld [vmem:[%s1048_s2 + $0x10] sm:$0xff]  ;;  %s997_s22 = scalar_lea.hbm %s1049_s3, %s532_s10  ;;  %s409_s23 = scalar_lea.sflag [#allocation4], %s923_s11 }
  0x3d   : > { %578 = vmatprep.subr.bf16.mxu0 %v577_v4  ;;  %593 = vmatprep.subr.bf16.mxu1 %v577_v4  ;;  %v210_v10 = vld [vmem:[%s1047_s1 + $0x20] sm:$0xff]  ;;  %v585_v11 = vpack.c.bf16 %v219_v8, %v218_v7  ;;  %v220_v14 = vld [vmem:[%s183_s21 + $0x30] sm:$0xff]  ;;  %v221_v15 = vld [vmem:[%s183_s21 + $0x38] sm:$0xff]  ;;  %s700_s28 = scalar_lea.vmem %s992_s9, 1024  ;;  %p1057_p9 = scmp.ne.s32.totalorder %s1053_s25, 0 }
  0x3e   : > { %580 = vmatpush3.bf16.msra.mxu0 %v577_v4  ;;  %597 = vmatpush3.bf16.msra.mxu1 %v577_v4  ;;  %v222_v13 = vld [vmem:[%s1048_s2] sm:$0xff]  ;;  %v225_v16 = vld [vmem:[%s1048_s2 + $0x18] sm:$0xff]  ;;  %v223_v17 = vld [vmem:[%s1048_s2 + $0x8] sm:$0xff]  ;;  %v589_v18 = vpack.c.bf16 %v221_v15, %v220_v14  ;;  %p701_p8 = scmp.ne.s32.totalorder %s992_s9, %s700_s28  ;;  %s788_s29 = smov [#allocation5]  }
  0x3f   : > { %582 = vmatprep.subr.bf16.mxu0 %v581_v6  ;;  %594 = vmatprep.subr.bf16.mxu1 %v581_v6  ;;  %v227_v19 = vld [vmem:[%s1048_s2 + $0x28] sm:$0xff]  ;;  %v226_v20 = vld [vmem:[%s1048_s2 + $0x20] sm:$0xff]  ;;  %v208_v23 = vld [vmem:[%s1047_s1 + $0x10] sm:$0xff]  ;;  %s704_s30 = sshll.u32 %s788_s29, 4  ;;  %s705_s30 = int_to_ptr.vmem [resolvable:$false] %s704_s30 }
  0x40   : > { %565 = vmatprep.mubr.msk.f32.mxu0 %vm270_vm0, %v206_v9  ;;  %571 = vmatprep.mubr.msk.f32.mxu1 %vm270_vm0, %v210_v10  ;;  %v207_v21 = vld [vmem:[%s1047_s1 + $0x8] sm:$0xff]  ;;  %v212_v24 = vld [vmem:[%s1047_s1 + $0x30] sm:$0xff]  ;;  %v229_v25 = vld [vmem:[%s1048_s2 + $0x38] sm:$0xff]  ;;  %p702_p11 = pnand %p701_p8, %p1057_p9  ;;  %s706_s4 = scalar_lea.vmem %s705_s30, 2048 }
  0x41   : > { %242 = vperm.xlu1 %669, %v224_v12   ;;  %232 = vperm.xlu0 %668, %v222_v13   ;;  %v211_v22 = vld [vmem:[%s1047_s1 + $0x28] sm:$0xff]  ;;  %v228_v26 = vld [vmem:[%s1048_s2 + $0x30] sm:$0xff]  ;;  %v209_v27 = vld [vmem:[%s1047_s1 + $0x18] sm:$0xff]  ;;  %p707_p6 = scmp.lt.s32.totalorder %s992_s9, %s705_s30  ;;  %p708_p13 = scmp.lt.s32.totalorder %s706_s4, %s700_s28 }
  0x42   : > { %584 = vmatpush3.bf16.msra.mxu0 %v581_v6  ;;  %598 = vmatpush3.bf16.msra.mxu1 %v581_v6  ;;  %v213_v28 = vld [vmem:[%s1047_s1 + $0x38] sm:$0xff]  ;;  %p703_p0 = pneg %p702_p11 }
  0x43   : > { %586 = vmatprep.subr.bf16.mxu0 %v585_v11  ;;  %595 = vmatprep.subr.bf16.mxu1 %v585_v11  ;;  %p709_p2 = por %p708_p13, %p707_p6 }
  0x45   : > { %247 = vperm.xlu1 %669, %v225_v16   ;;  %237 = vperm.xlu0 %668, %v223_v17   ;;  %p710_p5 = pnand %p709_p2, %p703_p0 }
  0x46   : > { %588 = vmatpush3.bf16.msra.mxu0 %v585_v11  ;;  %599 = vmatpush3.bf16.msra.mxu1 %v585_v11 }
  0x47   : > { %590 = vmatprep.subr.bf16.mxu0 %v589_v18  ;;  %596 = vmatprep.subr.bf16.mxu1 %v589_v18 }
  0x49   : > { %257 = vperm.xlu1 %669, %v227_v19   ;;  %252 = vperm.xlu0 %668, %v226_v20  }
  0x4a   : > { %592 = vmatpush3.bf16.msra.mxu0 %v589_v18  ;;  %600 = vmatpush3.bf16.msra.mxu1 %v589_v18 }
  0x4d   : > { %566 = vmatmul.mubr.msk.f32.vlgmr.msra.gmra.mrb[0].mxu0 %vm270_vm0, %v207_v21  ;;  %572 = vmatmul.mubr.msk.f32.vlgmr.msra.gmra.mrb[0].mxu1 %vm270_vm0, %v211_v22 }
  0x4e   : > { %568 = vmatprep.mubr.msk.f32.mxu0 %vm270_vm0, %v208_v23  ;;  %574 = vmatprep.mubr.msk.f32.mxu1 %vm270_vm0, %v212_v24 }
  0x4f   : > { %267 = vperm.xlu1 %669, %v229_v25   ;;  %262 = vperm.xlu0 %668, %v228_v26  }
  0x51   : > { %569 = vmatmul.mubr.msk.f32.gmra.mrb[2].mxu0 %vm270_vm0, %v209_v27  ;;  %575 = vmatmul.mubr.msk.f32.gmra.mrb[2].mxu1 %vm270_vm0, %v213_v28 }
  0xc0   : > { %v243_v29 = vpop.permute.xlu1 %242  ;;  %v233_v30 = vpop.permute.xlu0 %232 }
  0xc4   : > { %v248_v31 = vpop.permute.xlu1 %247  ;;  %v238_v32 = vpop.permute.xlu0 %237 }
  0xc8   : > { %v258_v33 = vpop.permute.xlu1 %257  ;;  %v253_v34 = vpop.permute.xlu0 %252 }
  0xce   : > { %v268_v43 = vpop.permute.xlu1 %267  ;;  %v263_v44 = vpop.permute.xlu0 %262 }
 0x120   : > { %v567_v35 = vpop.f32.mrb[0].mxu0  ;;  %v573_v36 = vpop.f32.mrb[0].mxu1 }
 0x121   : > { %v367_v37 = vadd.f32 %v567_v35, %v238_v32  ;;  %v387_v38 = vadd.f32 %v573_v36, %v258_v33  ;;  %v361_v39 = vpop.f32.mrb[1].mxu0  ;;  %v381_v40 = vpop.f32.mrb[1].mxu1 }
 0x122   : > { %v362_v41 = vadd.f32 %v361_v39, %v233_v30  ;;  %v382_v42 = vadd.f32 %v381_v40, %v253_v34 }
 0x123   : > { %401 = vst [vmem:[%s205_s24 + $0x8] sm:$0xff] %v367_v37  ;;  %405 = vst [vmem:[%s205_s24 + $0x28] sm:$0xff] %v387_v38 }
 0x124   : > { %400 = vst [vmem:[%s205_s24] sm:$0xff] %v362_v41  ;;  %404 = vst [vmem:[%s205_s24 + $0x20] sm:$0xff] %v382_v42  ;;  %v570_v45 = vpop.f32.mrb[2].mxu0  ;;  %v576_v46 = vpop.f32.mrb[2].mxu1 }
 0x125   : > { %v377_v47 = vadd.f32 %v570_v45, %v248_v31  ;;  %v397_v48 = vadd.f32 %v576_v46, %v268_v43  ;;  %v371_v49 = vpop.f32.mrb[3].mxu0  ;;  %v391_v50 = vpop.f32.mrb[3].mxu1 }
 0x126   : > { %v372_v51 = vadd.f32 %v371_v49, %v243_v29  ;;  %v392_v52 = vadd.f32 %v391_v50, %v263_v44 }
 0x127   : > { %403 = vst [vmem:[%s205_s24 + $0x18] sm:$0xff] %v377_v47  ;;  %407 = vst [vmem:[%s205_s24 + $0x38] sm:$0xff] %v397_v48 }
 0x128   : > { %402 = vst [vmem:[%s205_s24 + $0x10] sm:$0xff] %v372_v51  ;;  %406 = vst [vmem:[%s205_s24 + $0x30] sm:$0xff] %v392_v52 }
 0x129   : > { %713 = shalt.err (!%p710_p5)
}
 0x12a   : > { %s714_s5 = scalar_lea.hbm %s997_s22, 1024  ;;  %s718_s21 = scalar_lea.hbm %s1049_s3, 2048 }
 0x12b   : > { %p715_p4 = scmp.ne.s32.totalorder %s997_s22, %s714_s5  ;;  %p719_p12 = scmp.lt.u32.totalorder %s997_s22, %s1049_s3 }
 0x12c   : > { %p720_p1 = scmp.lt.u32.totalorder %s718_s21, %s714_s5  ;;  %p722_p8 = scmp.lt.u32.totalorder %s714_s5, %s997_s22 }
 0x12d   : > { %p716_p7 = pnand %p715_p4, %p1057_p9 }
 0x12e   : > { %p721_p3 = por %p720_p1, %p719_p12 }
 0x12f   : > { %p717_p10 = pneg %p716_p7 }
 0x130   : > { %p723_p11 = por %p722_p8, %p721_p3 }
 0x132   : > { %p724_p0 = pnand %p723_p11, %p717_p10 }
 0x134   : > { %727 = shalt.err (!%p724_p0)
}
 0x135   : > { %s789_s24 = smov 128   ;;  %s790_s10 = smov 8  }
 0x136   : > { %603 = dma.vmem_to_hbm [thread:$0]  (%p1057_p9), %s992_s9, 1024, %s997_s22, %s409_s23, %s789_s24, %s789_s24, %s790_s10  }
 0x137 PF: > { %s438_s18 = sand.u32 1, %s762_s12   ;;  %p1058_p6 = scmp.ne.s32.totalorder %s1054_s27, 0 }
 0x138   : > { %p1059_p13 = scmp.ge.s32.totalorder %s782_s17, 2  ;;  %s439_s15 = scalar_lea.sflag [#allocation4], %s438_s18 }
 0x13a   : > { %p610_p2 = pnand %p1059_p13, %p1058_p6 }
 0x13c   : > { %757 = dma.done.wait (!%p610_p2), %s439_s15, 1024  }
 0x13d   : > { %759 = vsyncadd (!%p610_p2), %s439_s15, 4294966272  ;;  %s19_s17 = sadd.s32 1, %s782_s17   ;;  %s1060_s12 = smov %s766_s13 }
 0x13e   : > { %p16_p5 = scmp.ge.s32.totalorder %s19_s17, 4   ;;  %s1061_s13 = smov %s770_s14 }
 0x13f   : > { %s1062_s14 = smov %s867_s26  ;;  %s1063_s15 = smov %s778_s16 }
 0x140   : > { %s1064_s16 = smov %s1066_s20  ;;  %18 = sbr.rel (!%p16_p5) target bundleno = 6 (0x6), region = 77 }
 0x147   :  { %444 = vsyncpa [#allocation3], 1 }
 0x148   :  { %446 = vsyncpa [#allocation3 + $0x1], 1 }
 0x149   :  { %447 = vsyncpa [#allocation4], 1 }
 0x14a   :  { %449 = vsyncpa [#allocation4 + $0x1], 1 }

// kernel: tpu_custom_call.1
= control target key start
LH: loop header
LB: loop body
LE: loop exit
PB: predicated region body
PF: predicated region fallthrough
CT: control target
= control target key end

     0   :  { %8 = vsyncpa [#allocation3], 0  ;;  %s1046_s0 = inlined_call_operand.hbm [shape: f32[2,64,128], index: 0, kind: input, shape index: {}]   ;;  %s1047_s1 = inlined_call_operand.vmem [shape: f32[64,64], index: 1, kind: input, shape index: {}]   ;;  %s1048_s2 = inlined_call_operand.vmem [shape: f32[64,1], index: 2, kind: input, shape index: {}]   ;;  %s1049_s3 = inlined_call_operand.hbm [shape: f32[2,64,128], index: 3, kind: output, shape index: {}]  }
   0x1   :  { %10 = vsyncpa [#allocation3 + $0x1], 0 }
   0x2   :  { %11 = vsyncpa [#allocation4], 0 }
   0x3   :  { %13 = vsyncpa [#allocation4 + $0x1], 0  ;;  %s811_s12 = smov 0   ;;  %s813_s13 = smov 0  }
   0x4   :  { %s815_s14 = smov 0   ;;  %s817_s15 = smov 0  }
   0x5   :  { %s819_s16 = smov 0   ;;  %s821_s17 = smov 0  }
   0x6 LB: > { %s508_s18 = sadd.s32 4294967295, %s782_s17   ;;  %s509_s19 = sadd.s32 4294967294, %s782_s17   ;;  %s782_s17 = sphi %s821_s17, %s19_s17   ;;  %s778_s16 = sphi %s819_s16, %s1064_s16   ;;  %s774_s15 = sphi %s817_s15, %s1063_s15   ;;  %s770_s14 = sphi %s815_s14, %s1062_s14   ;;  %s766_s13 = sphi %s813_s13, %s1061_s13   ;;  %s762_s12 = sphi %s811_s12, %s1060_s12  }
   0x7   : > { %s31_s20 = sadd.s32 1, %s778_s16  ;;  %s40_s21 = sadd.s32 1, %s770_s14 }
   0x8   : > { %p33_p0 = scmp.ge.s32.totalorder %s31_s20, 2  ;;  %p47_p1 = scmp.ne.s32.totalorder %s770_s14, %s766_s13 }
   0x9   : > { %p48_p2 = scmp.eq.s32.totalorder %s782_s17, 0  ;;  %p53_p3 = scmp.ne.s32.totalorder %s766_s13, %s762_s12 }
   0xa   : > { %s1066_s20 = smov (%p33_p0, %s31_s20), 0  ;;  %p54_p5 = scmp.eq.s32.totalorder %s508_s18, 0 }
   0xb   : > { %p852_p4 = por %p48_p2, %p47_p1  ;;  %s35_s23 = ssub.s32 %s778_s16, %s1066_s20 }
   0xc   : > { %p121_p6 = scmp.eq.s32.totalorder %s508_s18, 1  ;;  %p38_p7 = scmp.eq.s32.totalorder %s35_s23, 0 }
   0xd   : > { %p858_p8 = por %p54_p5, %p53_p3  ;;  %p127_p10 = scmp.eq.s32.totalorder %s509_s19, 1 }
   0xe   : > { %p862_p9 = por %p121_p6, %p47_p1  ;;  %p613_p13 = scmp.lt.s32.totalorder %s782_s17, 2 }
   0xf   : > { %s867_s26 = scalar_select %p38_p7, %s770_s14, %s40_s21  }
  0x10   : > { %s1053_s25 = scalar_select %p862_p9, 1, 0 }
  0x11   : > { %p869_p11 = por %p127_p10, %p53_p3  ;;  %s153_s28 = sand.u32 1, %s770_s14  }
  0x12   : > { %s512_s29 = sshll.u32 %s153_s28, 6  ;;  %s531_s30 = sshll.u32 %s778_s16, 10 }
  0x13   : > { %s1054_s27 = scalar_select %p869_p11, 1, 0 }
  0x14   : > { %s880_s6 = scalar_lea.hbm %s1046_s0, %s531_s30  ;;  %s157_s7 = scalar_lea.vmem [#allocation2], %s512_s29 }
  0x15   : > { %s165_s8 = sshll.u32 %s157_s7, 4  ;;  %p886_p0 = pnand %p613_p13, %p852_p4  ;;  %s882_s8 = int_to_ptr.vmem [resolvable:$true] %s165_s8 }
  0x16   : > { %s891_s10 = scalar_lea.sflag [#allocation3], %s153_s28  ;;  %s670_s11 = scalar_lea.hbm %s880_s6, 1024 }
  0x17   : > { %p671_p2 = scmp.ne.s32.totalorder %s880_s6, %s670_s11  ;;  %p672_p3 = pneg %p886_p0 }
  0x18   : > { %s675_s21 = scalar_lea.hbm %s1046_s0, 2048  ;;  %p676_p4 = scmp.lt.u32.totalorder %s880_s6, %s1046_s0 }
  0x19   : > { %p673_p5 = pnand %p672_p3, %p671_p2  ;;  %p677_p7 = scmp.lt.u32.totalorder %s675_s21, %s670_s11 }
  0x1a   : > { %p679_p13 = scmp.lt.u32.totalorder %s670_s11, %s880_s6 }
  0x1b   : > { %p674_p6 = pneg %p673_p5  ;;  %p678_p10 = por %p677_p7, %p676_p4 }
  0x1d   : > { %p680_p12 = por %p679_p13, %p678_p10 }
  0x1f   : > { %p681_p1 = pnand %p680_p12, %p674_p6 }
  0x21   : > { %684 = shalt.err (!%p681_p1)
}
  0x22   : > { %s685_s28 = scalar_lea.vmem %s882_s8, 1024  ;;  %s784_s29 = smov [#allocation2]  }
  0x23   : > { %p686_p2 = scmp.ne.s32.totalorder %s882_s8, %s685_s28  ;;  %s690_s30 = sshll.u32 %s784_s29, 4  ;;  %s691_s30 = int_to_ptr.vmem [resolvable:$false] %s690_s30 }
  0x24   : > { %s692_s4 = scalar_lea.vmem %s691_s30, 2048  ;;  %p693_p9 = scmp.lt.s32.totalorder %s882_s8, %s691_s30 }
  0x25   : > { %p688_p5 = pnand %p686_p2, %p672_p3  ;;  %p694_p4 = scmp.lt.s32.totalorder %s692_s4, %s685_s28 }
  0x27   : > { %p689_p11 = pneg %p688_p5  ;;  %p695_p7 = por %p694_p4, %p693_p9 }
  0x29   : > { %p696_p10 = pnand %p695_p7, %p689_p11 }
  0x2b   : > { %699 = shalt.err (!%p696_p10)
}
  0x2c   : > { %s785_s5 = smov 128   ;;  %s786_s7 = smov 8  }
  0x2d   : > { %608 = dma.hbm_to_vmem [thread:$0]  (!%p886_p0), %s880_s6, 1024, %s882_s8, %s891_s10, %s785_s5, %s785_s5, %s786_s7  }
  0x2e   : > { %p173_p12 = scmp.lt.s32.totalorder %s782_s17, 3  ;;  %p1056_p1 = scmp.ge.s32.totalorder %s782_s17, 1 }
  0x30   : > { %p174_p3 = pnand %p1056_p1, %p173_p12 }
  0x31   : > { %s923_s11 = sand.u32 (!%p174_p3), 1, %s766_s13  }
  0x32   : > { %177 = sbr.rel (%p174_p3) target bundleno = 311 (0x137), region = 32  ;;  %s516_s18 = sshll.u32 (!%p174_p3), %s923_s11, 6 }
  0x33   : > { %s180_s19 = scalar_lea.sflag (!%p174_p3), [#allocation3], %s923_s11  ;;  %s183_s21 = scalar_lea.vmem (!%p174_p3), [#allocation2], %s516_s18 }
  0x39   : > { %753 = dma.done.wait (%p858_p8), %s180_s19, 1024  }
  0x3a   : > { %755 = vsyncadd (%p858_p8), %s180_s19, 4294966272  ;;  %v787_v0 = vmov 0   ;;  %v214_v1 = vld [vmem:[%s183_s21] sm:$0xff]  ;;  %v215_v2 = vld [vmem:[%s183_s21 + $0x8] sm:$0xff]  ;;  %vm270_vm0 = vcmask 523264   ;;  %s205_s24 = scalar_lea.vmem [#allocation5], %s516_s18 }
  0x3b   : > { %669 = vset.pattern.permute.xlu1 %v787_v0  ;;  %668 = vset.pattern.permute.xlu0 %v787_v0  ;;  %v216_v3 = vld [vmem:[%s183_s21 + $0x10] sm:$0xff]  ;;  %v577_v4 = vpack.c.bf16 %v215_v2, %v214_v1  ;;  %v217_v5 = vld [vmem:[%s183_s21 + $0x18] sm:$0xff]  ;;  %v218_v7 = vld [vmem:[%s183_s21 + $0x20] sm:$0xff]  ;;  %s423_s9 = sshll.u32 %s205_s24, 4  ;;  %s532_s10 = sshll.u32 %s774_s15, 10  ;;  %s992_s9 = int_to_ptr.vmem [resolvable:$true] %s423_s9 }
  0x3c   : > { %v581_v6 = vpack.c.bf16 %v217_v5, %v216_v3  ;;  %v219_v8 = vld [vmem:[%s183_s21 + $0x28] sm:$0xff]  ;;  %v206_v9 = vld [vmem:[%s1047_s1] sm:$0xff]  ;;  %v224_v12 = vld [vmem:[%s1048_s2 + $0x10] sm:$0xff]  ;;  %s997_s22 = scalar_lea.hbm %s1049_s3, %s532_s10  ;;  %s409_s23 = scalar_lea.sflag [#allocation4], %s923_s11 }
  0x3d   : > { %578 = vmatprep.subr.bf16.mxu0 %v577_v4  ;;  %593 = vmatprep.subr.bf16.mxu1 %v577_v4  ;;  %v210_v10 = vld [vmem:[%s1047_s1 + $0x20] sm:$0xff]  ;;  %v585_v11 = vpack.c.bf16 %v219_v8, %v218_v7  ;;  %v220_v14 = vld [vmem:[%s183_s21 + $0x30] sm:$0xff]  ;;  %v221_v15 = vld [vmem:[%s183_s21 + $0x38] sm:$0xff]  ;;  %s700_s28 = scalar_lea.vmem %s992_s9, 1024  ;;  %p1057_p9 = scmp.ne.s32.totalorder %s1053_s25, 0 }
  0x3e   : > { %580 = vmatpush3.bf16.msra.mxu0 %v577_v4  ;;  %597 = vmatpush3.bf16.msra.mxu1 %v577_v4  ;;  %v222_v13 = vld [vmem:[%s1048_s2] sm:$0xff]  ;;  %v225_v16 = vld [vmem:[%s1048_s2 + $0x18] sm:$0xff]  ;;  %v223_v17 = vld [vmem:[%s1048_s2 + $0x8] sm:$0xff]  ;;  %v589_v18 = vpack.c.bf16 %v221_v15, %v220_v14  ;;  %p701_p8 = scmp.ne.s32.totalorder %s992_s9, %s700_s28  ;;  %s788_s29 = smov [#allocation5]  }
  0x3f   : > { %582 = vmatprep.subr.bf16.mxu0 %v581_v6  ;;  %594 = vmatprep.subr.bf16.mxu1 %v581_v6  ;;  %v227_v19 = vld [vmem:[%s1048_s2 + $0x28] sm:$0xff]  ;;  %v226_v20 = vld [vmem:[%s1048_s2 + $0x20] sm:$0xff]  ;;  %v208_v23 = vld [vmem:[%s1047_s1 + $0x10] sm:$0xff]  ;;  %s704_s30 = sshll.u32 %s788_s29, 4  ;;  %s705_s30 = int_to_ptr.vmem [resolvable:$false] %s704_s30 }
  0x40   : > { %565 = vmatprep.mubr.msk.f32.mxu0 %vm270_vm0, %v206_v9  ;;  %571 = vmatprep.mubr.msk.f32.mxu1 %vm270_vm0, %v210_v10  ;;  %v207_v21 = vld [vmem:[%s1047_s1 + $0x8] sm:$0xff]  ;;  %v212_v24 = vld [vmem:[%s1047_s1 + $0x30] sm:$0xff]  ;;  %v229_v25 = vld [vmem:[%s1048_s2 + $0x38] sm:$0xff]  ;;  %p702_p11 = pnand %p701_p8, %p1057_p9  ;;  %s706_s4 = scalar_lea.vmem %s705_s30, 2048 }
  0x41   : > { %242 = vperm.xlu1 %669, %v224_v12   ;;  %232 = vperm.xlu0 %668, %v222_v13   ;;  %v211_v22 = vld [vmem:[%s1047_s1 + $0x28] sm:$0xff]  ;;  %v228_v26 = vld [vmem:[%s1048_s2 + $0x30] sm:$0xff]  ;;  %v209_v27 = vld [vmem:[%s1047_s1 + $0x18] sm:$0xff]  ;;  %p707_p6 = scmp.lt.s32.totalorder %s992_s9, %s705_s30  ;;  %p708_p13 = scmp.lt.s32.totalorder %s706_s4, %s700_s28 }
  0x42   : > { %584 = vmatpush3.bf16.msra.mxu0 %v581_v6  ;;  %598 = vmatpush3.bf16.msra.mxu1 %v581_v6  ;;  %v213_v28 = vld [vmem:[%s1047_s1 + $0x38] sm:$0xff]  ;;  %p703_p0 = pneg %p702_p11 }
  0x43   : > { %586 = vmatprep.subr.bf16.mxu0 %v585_v11  ;;  %595 = vmatprep.subr.bf16.mxu1 %v585_v11  ;;  %p709_p2 = por %p708_p13, %p707_p6 }
  0x45   : > { %247 = vperm.xlu1 %669, %v225_v16   ;;  %237 = vperm.xlu0 %668, %v223_v17   ;;  %p710_p5 = pnand %p709_p2, %p703_p0 }
  0x46   : > { %588 = vmatpush3.bf16.msra.mxu0 %v585_v11  ;;  %599 = vmatpush3.bf16.msra.mxu1 %v585_v11 }
  0x47   : > { %590 = vmatprep.subr.bf16.mxu0 %v589_v18  ;;  %596 = vmatprep.subr.bf16.mxu1 %v589_v18 }
  0x49   : > { %257 = vperm.xlu1 %669, %v227_v19   ;;  %252 = vperm.xlu0 %668, %v226_v20  }
  0x4a   : > { %592 = vmatpush3.bf16.msra.mxu0 %v589_v18  ;;  %600 = vmatpush3.bf16.msra.mxu1 %v589_v18 }
  0x4d   : > { %566 = vmatmul.mubr.msk.f32.vlgmr.msra.gmra.mrb[0].mxu0 %vm270_vm0, %v207_v21  ;;  %572 = vmatmul.mubr.msk.f32.vlgmr.msra.gmra.mrb[0].mxu1 %vm270_vm0, %v211_v22 }
  0x4e   : > { %568 = vmatprep.mubr.msk.f32.mxu0 %vm270_vm0, %v208_v23  ;;  %574 = vmatprep.mubr.msk.f32.mxu1 %vm270_vm0, %v212_v24 }
  0x4f   : > { %267 = vperm.xlu1 %669, %v229_v25   ;;  %262 = vperm.xlu0 %668, %v228_v26  }
  0x51   : > { %569 = vmatmul.mubr.msk.f32.gmra.mrb[2].mxu0 %vm270_vm0, %v209_v27  ;;  %575 = vmatmul.mubr.msk.f32.gmra.mrb[2].mxu1 %vm270_vm0, %v213_v28 }
  0xc0   : > { %v243_v29 = vpop.permute.xlu1 %242  ;;  %v233_v30 = vpop.permute.xlu0 %232 }
  0xc4   : > { %v248_v31 = vpop.permute.xlu1 %247  ;;  %v238_v32 = vpop.permute.xlu0 %237 }
  0xc8   : > { %v258_v33 = vpop.permute.xlu1 %257  ;;  %v253_v34 = vpop.permute.xlu0 %252 }
  0xce   : > { %v268_v43 = vpop.permute.xlu1 %267  ;;  %v263_v44 = vpop.permute.xlu0 %262 }
 0x120   : > { %v567_v35 = vpop.f32.mrb[0].mxu0  ;;  %v573_v36 = vpop.f32.mrb[0].mxu1 }
 0x121   : > { %v367_v37 = vadd.f32 %v567_v35, %v238_v32  ;;  %v387_v38 = vadd.f32 %v573_v36, %v258_v33  ;;  %v361_v39 = vpop.f32.mrb[1].mxu0  ;;  %v381_v40 = vpop.f32.mrb[1].mxu1 }
 0x122   : > { %v362_v41 = vadd.f32 %v361_v39, %v233_v30  ;;  %v382_v42 = vadd.f32 %v381_v40, %v253_v34 }
 0x123   : > { %401 = vst [vmem:[%s205_s24 + $0x8] sm:$0xff] %v367_v37  ;;  %405 = vst [vmem:[%s205_s24 + $0x28] sm:$0xff] %v387_v38 }
 0x124   : > { %400 = vst [vmem:[%s205_s24] sm:$0xff] %v362_v41  ;;  %404 = vst [vmem:[%s205_s24 + $0x20] sm:$0xff] %v382_v42  ;;  %v570_v45 = vpop.f32.mrb[2].mxu0  ;;  %v576_v46 = vpop.f32.mrb[2].mxu1 }
 0x125   : > { %v377_v47 = vadd.f32 %v570_v45, %v248_v31  ;;  %v397_v48 = vadd.f32 %v576_v46, %v268_v43  ;;  %v371_v49 = vpop.f32.mrb[3].mxu0  ;;  %v391_v50 = vpop.f32.mrb[3].mxu1 }
 0x126   : > { %v372_v51 = vadd.f32 %v371_v49, %v243_v29  ;;  %v392_v52 = vadd.f32 %v391_v50, %v263_v44 }
 0x127   : > { %403 = vst [vmem:[%s205_s24 + $0x18] sm:$0xff] %v377_v47  ;;  %407 = vst [vmem:[%s205_s24 + $0x38] sm:$0xff] %v397_v48 }
 0x128   : > { %402 = vst [vmem:[%s205_s24 + $0x10] sm:$0xff] %v372_v51  ;;  %406 = vst [vmem:[%s205_s24 + $0x30] sm:$0xff] %v392_v52 }
 0x129   : > { %713 = shalt.err (!%p710_p5)
}
 0x12a   : > { %s714_s5 = scalar_lea.hbm %s997_s22, 1024  ;;  %s718_s21 = scalar_lea.hbm %s1049_s3, 2048 }
 0x12b   : > { %p715_p4 = scmp.ne.s32.totalorder %s997_s22, %s714_s5  ;;  %p719_p12 = scmp.lt.u32.totalorder %s997_s22, %s1049_s3 }
 0x12c   : > { %p720_p1 = scmp.lt.u32.totalorder %s718_s21, %s714_s5  ;;  %p722_p8 = scmp.lt.u32.totalorder %s714_s5, %s997_s22 }
 0x12d   : > { %p716_p7 = pnand %p715_p4, %p1057_p9 }
 0x12e   : > { %p721_p3 = por %p720_p1, %p719_p12 }
 0x12f   : > { %p717_p10 = pneg %p716_p7 }
 0x130   : > { %p723_p11 = por %p722_p8, %p721_p3 }
 0x132   : > { %p724_p0 = pnand %p723_p11, %p717_p10 }
 0x134   : > { %727 = shalt.err (!%p724_p0)
}
 0x135   : > { %s789_s24 = smov 128   ;;  %s790_s10 = smov 8  }
 0x136   : > { %603 = dma.vmem_to_hbm [thread:$0]  (%p1057_p9), %s992_s9, 1024, %s997_s22, %s409_s23, %s789_s24, %s789_s24, %s790_s10  }
 0x137 PF: > { %s438_s18 = sand.u32 1, %s762_s12   ;;  %p1058_p6 = scmp.ne.s32.totalorder %s1054_s27, 0 }
 0x138   : > { %p1059_p13 = scmp.ge.s32.totalorder %s782_s17, 2  ;;  %s439_s15 = scalar_lea.sflag [#allocation4], %s438_s18 }
 0x13a   : > { %p610_p2 = pnand %p1059_p13, %p1058_p6 }
 0x13c   : > { %757 = dma.done.wait (!%p610_p2), %s439_s15, 1024  }
 0x13d   : > { %759 = vsyncadd (!%p610_p2), %s439_s15, 4294966272  ;;  %s19_s17 = sadd.s32 1, %s782_s17   ;;  %s1060_s12 = smov %s766_s13 }
 0x13e   : > { %p16_p5 = scmp.ge.s32.totalorder %s19_s17, 4   ;;  %s1061_s13 = smov %s770_s14 }
 0x13f   : > { %s1062_s14 = smov %s867_s26  ;;  %s1063_s15 = smov %s778_s16 }
 0x140   : > { %s1064_s16 = smov %s1066_s20  ;;  %18 = sbr.rel (!%p16_p5) target bundleno = 6 (0x6), region = 77 }
 0x147   :  { %444 = vsyncpa [#allocation3], 1 }
 0x148   :  { %446 = vsyncpa [#allocation3 + $0x1], 1 }
 0x149   :  { %447 = vsyncpa [#allocation4], 1 }
 0x14a   :  { %449 = vsyncpa [#allocation4 + $0x1], 1 }

</bundles_post_ra>
